<compile_context>
chip_gen: v6e
topology: v6e:2x2x1
jax: 0.10.0
libtpu: 0.0.40
codegen_flags: <defaults>
</compile_context>

<pallas_src>
import functools

import jax
import jax.numpy as jnp
from jax import lax
from jax.experimental import pallas as pl
from jax.experimental.pallas import tpu as pltpu

IGNORE_INDEX = -100


def _ce2d_kernel(x_ref, t_ref, sum_ref, cnt_ref, *, ignore_index, num_rows, sr):
    """One (nb, jo, ji) grid step over a (BN, C, SR, L) logits tile.

    Accumulates this tile's NLL sum (f32) and valid-pixel count (int32)
    directly into the resident (1, 1) output blocks for (nb, jo).
    """
    jo = pl.program_id(1)
    ji = pl.program_id(2)
    n_ji = pl.num_programs(2)
    row_block = jo * n_ji + ji                     # global pixel-row block index

    @pl.when(ji == 0)
    def _():
        sum_ref[...] = jnp.zeros_like(sum_ref)
        cnt_ref[...] = jnp.zeros_like(cnt_ref)

    x = x_ref[...].astype(jnp.float32)             # (BN, C, SR, L)
    t = t_ref[...]                                 # (BN, SR, L) int32

    # Class reductions over axis=1: per-(SR, L)-plane VPU/EUP work on packed
    # vregs (no sublane padding, no cross-sublane XLU reduces).
    m = jnp.max(x, axis=1, keepdims=True)                              # (BN,1,SR,L)
    lse = m[:, 0] + jnp.log(jnp.sum(jnp.exp(x - m), axis=1))           # (BN,SR,L)

    # Target-class logit via one-hot select + reduce (no dynamic gather).
    # NOTE: targets outside [0, C) that are not ignore_index contribute
    # loss = lse (target logit treated as 0) instead of erroring like PyTorch.
    cls = lax.broadcasted_iota(jnp.int32, x.shape, 1)                  # (BN,C,SR,L)
    tgt = jnp.sum(jnp.where(cls == t[:, None], x, 0.0), axis=1)        # (BN,SR,L)

    # Valid = not ignore_index AND inside the real (un-padded) pixel rows.
    row = lax.broadcasted_iota(jnp.int32, t.shape, 1)                  # (BN,SR,L)
    valid = jnp.logical_and(t != ignore_index, row_block * sr + row < num_rows)

    # where() (not multiply-by-mask) also discards garbage/NaN from ragged
    # or out-of-bounds tail rows of the last row-block.
    loss = jnp.where(valid, lse - tgt, 0.0)                            # (BN,SR,L)

    sum_ref[...] += jnp.sum(loss)
    # Per-tile count fits well below 2^24, so the f32 reduce is exact; the
    # cross-tile accumulation happens in int32 (exact for any realistic size).
    cnt_ref[...] += jnp.sum(valid.astype(jnp.float32)).astype(jnp.int32)


def _vmem_capacity_bytes():
    try:
        info = pltpu.get_tpu_info()
        cap = getattr(info, "vmem_capacity_bytes", None)
        if cap:
            return int(cap)
    except Exception:
        pass
    return 64 << 20  # conservative default: v7x per-TensorCore VMEM


def _choose_tiling(num_pixels, num_classes, batch, itemsize):
    """Pick (lane, rows, pad, bn, sr, jo, ji) for the (BN, C, SR, L) block."""
    # ~8 MiB of logits per block (generation-aware cap at VMEM/8).
    target = min(8 << 20, max(1 << 20, _vmem_capacity_bytes() // 8))

    # Lane width: widest multiple of 128 that divides H*W (free reshape) and
    # keeps a minimal (C, 8, L) row-group under the byte target.
    lane = 128
    for cand in (1024, 512, 256):
        if num_pixels % cand == 0 and num_classes * 8 * cand * itemsize <= target:
            lane = cand
            break
    rows = -(-num_pixels // lane)            # pixel rows per image (after pad)
    pad = rows * lane - num_pixels           # > 0 only if H*W % 128 != 0

    img_bytes = num_classes * rows * lane * itemsize
    if img_bytes <= target:
        # A whole image's logits fit in one block: batch images per block.
        bn = min(batch, max(1, target // img_bytes))
        while batch % bn:
            bn -= 1
        sr = rows
    else:
        bn = 1
        sr = max(8, (target // (num_classes * lane * itemsize)) // 8 * 8)
        if sr >= rows:
            sr = rows
        elif batch == 1:
            # Prefer an SR giving an even row-block count so the parallel
            # `jo` axis can keep both v7x TensorCores busy.
            if (-(-rows // sr)) % 2 == 1:
                for cand in range(sr - 8, max(sr - 64, 7), -8):
                    if (-(-rows // cand)) % 2 == 0:
                        sr = cand
                        break

    n_img_blocks = batch // bn
    rb = -(-rows // sr)                      # row blocks per image
    jo = 2 if (n_img_blocks == 1 and rb >= 2 and rb % 2 == 0) else 1
    ji = rb // jo                            # exact: jo == 2 only when rb even
    return lane, rows, pad, bn, sr, jo, ji


def cross_entropy_loss_2d(inputs, targets, *, ignore_index=IGNORE_INDEX):
    """inputs: (N, C, H, W) float logits; targets: (N, H, W) int class ids.

    Matches nn.NLLLoss(weight=None, size_average=True, ignore_index)(
        F.log_softmax(inputs, dim=1), targets).
    """
    # TODO(synk): optional per-class `weight` vector (module default is None) not implemented.
    N, C, H, W = inputs.shape
    P = H * W
    itemsize = jnp.dtype(inputs.dtype).itemsize

    lane, rows, pad, bn, sr, jo, ji_n = _choose_tiling(P, C, N, itemsize)

    x = inputs.reshape(N, C, P)
    t = targets.reshape(N, P).astype(jnp.int32)
    if pad:
        # Rare path (H*W not a multiple of 128): one extra HBM copy; padded
        # targets are ignore_index so they are masked out in-kernel.
        x = jnp.pad(x, ((0, 0), (0, 0), (0, pad)))
        t = jnp.pad(t, ((0, 0), (0, pad)), constant_values=ignore_index)
    # Free reshapes of contiguous arrays -- classes stay a leading block dim.
    x = x.reshape(N, C, rows, lane)
    t = t.reshape(N, rows, lane)

    nb = N // bn
    grid = (nb, jo, ji_n)

    # VMEM budget from the actual pipelined footprint (double-buffered inputs)
    # plus ~25% slack; stays well inside v7x's 64 MiB core.
    x_block_bytes = bn * C * sr * lane * itemsize
    t_block_bytes = bn * sr * lane * 4
    vmem_limit = (2 * (x_block_bytes + t_block_bytes)) * 5 // 4 + (1 << 20)
    vmem_limit = int(max(4 << 20, min(vmem_limit, 100 << 20)))

    kernel = functools.partial(
        _ce2d_kernel, ignore_index=ignore_index, num_rows=rows, sr=sr)

    sum_out, cnt_out = pl.pallas_call(
        kernel,
        out_shape=(
            jax.ShapeDtypeStruct((nb, jo, 1, 1), jnp.float32),
            jax.ShapeDtypeStruct((nb, jo, 1, 1), jnp.int32),
        ),
        grid_spec=pltpu.PrefetchScalarGridSpec(
            num_scalar_prefetch=0,
            grid=grid,
            in_specs=[
                pl.BlockSpec((bn, C, sr, lane),
                             lambda b, o, i: (b, 0, o * ji_n + i, 0)),
                pl.BlockSpec((bn, sr, lane),
                             lambda b, o, i: (b, o * ji_n + i, 0)),
            ],
            out_specs=[
                pl.BlockSpec((None, None, 1, 1), lambda b, o, i: (b, o, 0, 0)),
                pl.BlockSpec((None, None, 1, 1), lambda b, o, i: (b, o, 0, 0)),
            ],
        ),
        compiler_params=pltpu.CompilerParams(
            dimension_semantics=("parallel", "parallel", "arbitrary"),
            vmem_limit_bytes=vmem_limit,
        ),
    )(x, t)

    total_sum = jnp.sum(sum_out)
    total_cnt = jnp.sum(cnt_out)
    # Mean over non-ignored pixels (like PyTorch, NaN if every pixel is ignored).
    return total_sum / total_cnt.astype(jnp.float32)


def _reference(inputs, targets, ignore_index=IGNORE_INDEX):
    # Pure-JAX reference for sanity checking.
    logp = jax.nn.log_softmax(inputs.astype(jnp.float32), axis=1)  # (N,C,H,W)
    t = targets.astype(jnp.int32)
    valid = t != ignore_index
    safe_t = jnp.where(valid, t, 0)
    picked = jnp.take_along_axis(logp, safe_t[:, None, :, :], axis=1)[:, 0]  # (N,H,W)
    nll = jnp.where(valid, -picked, 0.0)
    return jnp.sum(nll) / jnp.sum(valid)


if __name__ == "__main__":
    key = jax.random.PRNGKey(0)
    k1, k2 = jax.random.split(key)

    N, C, H, W = 2, 4, 16, 16
    inputs = jax.random.normal(k1, (N, C, H, W), dtype=jnp.float32)
    targets = jax.random.randint(k2, (N, H, W), 0, C, dtype=jnp.int32)
    # Sprinkle a few ignore_index pixels to exercise masking.
    targets = targets.at[0, 0, :4].set(IGNORE_INDEX)

    loss = cross_entropy_loss_2d(inputs, targets)
    loss = jax.block_until_ready(loss)

    ref = _reference(inputs, targets)
    assert jnp.allclose(loss, ref, rtol=1e-5, atol=1e-5), (loss, ref)
    print("KERNEL_OK")
</pallas_src>

<mosaic_0001>
module attributes {stable_mosaic.version = 11 : i64} {
  func.func @_ce2d_kernel(%arg0: i32, %arg1: i32, %arg2: i32, %arg3: memref<2x4x1x256xf32, #tpu.memory_space<vmem>>, %arg4: memref<2x1x256xi32, #tpu.memory_space<vmem>>, %arg5: memref<1x1x1x1xf32, #tpu.memory_space<vmem>>, %arg6: memref<1x1x1x1xi32, #tpu.memory_space<vmem>>) attributes {dimension_semantics = [#tpu.dimension_semantics<parallel>, #tpu.dimension_semantics<parallel>, #tpu.dimension_semantics<arbitrary>], iteration_bounds = array<i64: 1, 1, 1>, scalar_prefetch = 0 : i64, scratch_operands = 0 : i64, tpu.core_type = #tpu.core_type<tc>, window_params = [{transform_indices = @transform_0, window_bounds = array<i64: 2, 4, 1, 256>}, {transform_indices = @transform_1, window_bounds = array<i64: 2, 1, 256>}, {transform_indices = @transform_2, window_bounds = array<i64: 1, 1, 1, 1>}, {transform_indices = @transform_3, window_bounds = array<i64: 1, 1, 1, 1>}]} {
    %c1_i32 = arith.constant 1 : i32
    %0 = arith.muli %arg1, %c1_i32 : i32
    %1 = arith.addi %0, %arg2 : i32
    %c0_i32 = arith.constant 0 : i32
    %2 = arith.cmpi eq, %arg2, %c0_i32 : i32
    %3 = arith.extui %2 : i1 to i32
    %c0_i32_0 = arith.constant 0 : i32
    %4 = arith.cmpi ne, %3, %c0_i32_0 : i32
    scf.if %4 {
      %cst_31 = arith.constant 0.000000e+00 : f32
      %60 = vector.broadcast %cst_31 : f32 to vector<1x1xf32>
      %c0_32 = arith.constant 0 : index
      %c0_33 = arith.constant 0 : index
      %c0_34 = arith.constant 0 : index
      %c0_35 = arith.constant 0 : index
      %61 = vector.load %arg5[%c0_32, %c0_33, %c0_34, %c0_35] : memref<1x1x1x1xf32, #tpu.memory_space<vmem>>, vector<1x1x1x1xf32>
      %62 = vector.shape_cast %61 : vector<1x1x1x1xf32> to vector<1x1xf32>
      %63 = vector.shape_cast %60 : vector<1x1xf32> to vector<1x1x1x1xf32>
      tpu.vector_store %arg5[%c0_32, %c0_33, %c0_34, %c0_35], %63 {strides = array<i32>} : memref<1x1x1x1xf32, #tpu.memory_space<vmem>>, vector<1x1x1x1xf32>,
      %c0_i32_36 = arith.constant 0 : i32
      %64 = vector.broadcast %c0_i32_36 : i32 to vector<1x1xi32>
      %c0_37 = arith.constant 0 : index
      %c0_38 = arith.constant 0 : index
      %c0_39 = arith.constant 0 : index
      %c0_40 = arith.constant 0 : index
      %65 = vector.load %arg6[%c0_37, %c0_38, %c0_39, %c0_40] : memref<1x1x1x1xi32, #tpu.memory_space<vmem>>, vector<1x1x1x1xi32>
      %66 = vector.shape_cast %65 : vector<1x1x1x1xi32> to vector<1x1xi32>
      %67 = vector.shape_cast %64 : vector<1x1xi32> to vector<1x1x1x1xi32>
      tpu.vector_store %arg6[%c0_37, %c0_38, %c0_39, %c0_40], %67 {strides = array<i32>} : memref<1x1x1x1xi32, #tpu.memory_space<vmem>>, vector<1x1x1x1xi32>,
    } else {
    }
    %c0 = arith.constant 0 : index
    %c0_1 = arith.constant 0 : index
    %c0_2 = arith.constant 0 : index
    %c0_3 = arith.constant 0 : index
    %5 = vector.load %arg3[%c0, %c0_1, %c0_2, %c0_3] : memref<2x4x1x256xf32, #tpu.memory_space<vmem>>, vector<2x4x1x256xf32>
    %c0_4 = arith.constant 0 : index
    %c0_5 = arith.constant 0 : index
    %c0_6 = arith.constant 0 : index
    %6 = vector.load %arg4[%c0_4, %c0_5, %c0_6] : memref<2x1x256xi32, #tpu.memory_space<vmem>>, vector<2x1x256xi32>
    %cst = arith.constant dense<0xFF800000> : vector<2x1x256xf32>
    %7 = vector.multi_reduction <maximumf>, %5, %cst [1] : vector<2x4x1x256xf32> to vector<2x1x256xf32>
    %8 = vector.shape_cast %7 : vector<2x1x256xf32> to vector<2x1x1x256xf32>
    %9 = vector.shape_cast %8 : vector<2x1x1x256xf32> to vector<2x1x256xf32>
    %10 = vector.broadcast %8 : vector<2x1x1x256xf32> to vector<2x4x1x256xf32>
    %11 = arith.subf %5, %10 : vector<2x4x1x256xf32>
    %12 = math.exp %11 : vector<2x4x1x256xf32>
    %cst_7 = arith.constant dense<0.000000e+00> : vector<2x1x256xf32>
    %13 = vector.multi_reduction <add>, %12, %cst_7 [1] : vector<2x4x1x256xf32> to vector<2x1x256xf32>
    %14 = math.log %13 : vector<2x1x256xf32>
    %15 = arith.addf %9, %14 : vector<2x1x256xf32>
    %16 = tpu.iota {dimensions = array<i32: 1>} : vector<2x4x1x256xi32>
    %17 = vector.shape_cast %6 : vector<2x1x256xi32> to vector<2x1x1x256xi32>
    %18 = vector.broadcast %17 : vector<2x1x1x256xi32> to vector<2x4x1x256xi32>
    %19 = arith.cmpi eq, %16, %18 : vector<2x4x1x256xi32>
    %cst_8 = arith.constant 0.000000e+00 : f32
    %20 = vector.broadcast %cst_8 : f32 to vector<2x4x1x256xf32>
    %21 = arith.select %19, %5, %20 : vector<2x4x1x256xi1>, vector<2x4x1x256xf32>
    %cst_9 = arith.constant dense<0.000000e+00> : vector<2x1x256xf32>
    %22 = vector.multi_reduction <add>, %21, %cst_9 [1] : vector<2x4x1x256xf32> to vector<2x1x256xf32>
    %23 = tpu.iota {dimensions = array<i32: 1>} : vector<2x1x256xi32>
    %c-100_i32 = arith.constant -100 : i32
    %24 = vector.broadcast %c-100_i32 : i32 to vector<2x1x256xi32>
    %25 = arith.cmpi ne, %6, %24 : vector<2x1x256xi32>
    %c1_i32_10 = arith.constant 1 : i32
    %26 = arith.muli %1, %c1_i32_10 : i32
    %27 = vector.broadcast %26 : i32 to vector<2x1x256xi32>
    %28 = arith.addi %27, %23 : vector<2x1x256xi32>
    %c1_i32_11 = arith.constant 1 : i32
    %29 = vector.broadcast %c1_i32_11 : i32 to vector<2x1x256xi32>
    %30 = arith.cmpi slt, %28, %29 : vector<2x1x256xi32>
    %31 = arith.andi %25, %30 : vector<2x1x256xi1>
    %32 = arith.subf %15, %22 : vector<2x1x256xf32>
    %cst_12 = arith.constant 0.000000e+00 : f32
    %33 = vector.broadcast %cst_12 : f32 to vector<2x1x256xf32>
    %34 = arith.select %31, %32, %33 : vector<2x1x256xi1>, vector<2x1x256xf32>
    %c0_13 = arith.constant 0 : index
    %c0_14 = arith.constant 0 : index
    %c0_15 = arith.constant 0 : index
    %c0_16 = arith.constant 0 : index
    %35 = vector.load %arg5[%c0_13, %c0_14, %c0_15, %c0_16] : memref<1x1x1x1xf32, #tpu.memory_space<vmem>>, vector<1x1x1x1xf32>
    %36 = vector.shape_cast %35 : vector<1x1x1x1xf32> to vector<1x1xf32>
    %37 = vector.shape_cast %34 : vector<2x1x256xf32> to vector<1x2x1x256xf32>
    %cst_17 = arith.constant dense<0.000000e+00> : vector<1xf32>
    %38 = vector.multi_reduction <add>, %37, %cst_17 [1, 2, 3] : vector<1x2x1x256xf32> to vector<1xf32>
    %39 = vector.shape_cast %38 : vector<1xf32> to vector<1x1x1x1xf32>
    %40 = vector.extract %39[0, 0, 0, 0] : f32 from vector<1x1x1x1xf32>
    %41 = vector.broadcast %40 : f32 to vector<1x1xf32>
    %42 = arith.addf %36, %41 : vector<1x1xf32>
    %c0_18 = arith.constant 0 : index
    %c0_19 = arith.constant 0 : index
    %c0_20 = arith.constant 0 : index
    %c0_21 = arith.constant 0 : index
    %43 = vector.load %arg5[%c0_18, %c0_19, %c0_20, %c0_21] : memref<1x1x1x1xf32, #tpu.memory_space<vmem>>, vector<1x1x1x1xf32>
    %44 = vector.shape_cast %43 : vector<1x1x1x1xf32> to vector<1x1xf32>
    %45 = vector.shape_cast %42 : vector<1x1xf32> to vector<1x1x1x1xf32>
    tpu.vector_store %arg5[%c0_18, %c0_19, %c0_20, %c0_21], %45 {strides = array<i32>} : memref<1x1x1x1xf32, #tpu.memory_space<vmem>>, vector<1x1x1x1xf32>,
    %c0_22 = arith.constant 0 : index
    %c0_23 = arith.constant 0 : index
    %c0_24 = arith.constant 0 : index
    %c0_25 = arith.constant 0 : index
    %46 = vector.load %arg6[%c0_22, %c0_23, %c0_24, %c0_25] : memref<1x1x1x1xi32, #tpu.memory_space<vmem>>, vector<1x1x1x1xi32>
    %47 = vector.shape_cast %46 : vector<1x1x1x1xi32> to vector<1x1xi32>
    %48 = arith.extui %31 : vector<2x1x256xi1> to vector<2x1x256xi32>
    %49 = arith.sitofp %48 : vector<2x1x256xi32> to vector<2x1x256xf32>
    %50 = vector.shape_cast %49 : vector<2x1x256xf32> to vector<1x2x1x256xf32>
    %cst_26 = arith.constant dense<0.000000e+00> : vector<1xf32>
    %51 = vector.multi_reduction <add>, %50, %cst_26 [1, 2, 3] : vector<1x2x1x256xf32> to vector<1xf32>
    %52 = vector.shape_cast %51 : vector<1xf32> to vector<1x1x1x1xf32>
    %53 = vector.extract %52[0, 0, 0, 0] : f32 from vector<1x1x1x1xf32>
    %54 = arith.fptosi %53 : f32 to i32
    %55 = vector.broadcast %54 : i32 to vector<1x1xi32>
    %56 = arith.addi %47, %55 : vector<1x1xi32>
    %c0_27 = arith.constant 0 : index
    %c0_28 = arith.constant 0 : index
    %c0_29 = arith.constant 0 : index
    %c0_30 = arith.constant 0 : index
    %57 = vector.load %arg6[%c0_27, %c0_28, %c0_29, %c0_30] : memref<1x1x1x1xi32, #tpu.memory_space<vmem>>, vector<1x1x1x1xi32>
    %58 = vector.shape_cast %57 : vector<1x1x1x1xi32> to vector<1x1xi32>
    %59 = vector.shape_cast %56 : vector<1x1xi32> to vector<1x1x1x1xi32>
    tpu.vector_store %arg6[%c0_27, %c0_28, %c0_29, %c0_30], %59 {strides = array<i32>} : memref<1x1x1x1xi32, #tpu.memory_space<vmem>>, vector<1x1x1x1xi32>,
    return
  }
  func.func @transform_0(%arg0: i32, %arg1: i32, %arg2: i32) -> (i32, i32, i32, i32) {
    %c1_i32 = arith.constant 1 : i32
    %0 = arith.muli %arg1, %c1_i32 : i32
    %1 = arith.addi %0, %arg2 : i32
    %c0_i32 = arith.constant 0 : i32
    %c0_i32_0 = arith.constant 0 : i32
    %c0_i32_1 = arith.constant 0 : i32
    return %arg0, %c0_i32, %1, %c0_i32_0 : i32, i32, i32, i32
  }
  func.func @transform_1(%arg0: i32, %arg1: i32, %arg2: i32) -> (i32, i32, i32) {
    %c1_i32 = arith.constant 1 : i32
    %0 = arith.muli %arg1, %c1_i32 : i32
    %1 = arith.addi %0, %arg2 : i32
    %c0_i32 = arith.constant 0 : i32
    %c0_i32_0 = arith.constant 0 : i32
    return %arg0, %1, %c0_i32 : i32, i32, i32
  }
  func.func @transform_2(%arg0: i32, %arg1: i32, %arg2: i32) -> (i32, i32, i32, i32) {
    %c0_i32 = arith.constant 0 : i32
    %c0_i32_0 = arith.constant 0 : i32
    %c0_i32_1 = arith.constant 0 : i32
    return %arg0, %arg1, %c0_i32, %c0_i32_0 : i32, i32, i32, i32
  }
  func.func @transform_3(%arg0: i32, %arg1: i32, %arg2: i32) -> (i32, i32, i32, i32) {
    %c0_i32 = arith.constant 0 : i32
    %c0_i32_0 = arith.constant 0 : i32
    %c0_i32_1 = arith.constant 0 : i32
    return %arg0, %arg1, %c0_i32, %c0_i32_0 : i32, i32, i32, i32
  }
}

</mosaic_0001>

<bundles_post_ra>
// kernel: tpu_custom_call.1
= control target key start
LH: loop header
LB: loop body
LE: loop exit
PB: predicated region body
PF: predicated region fallthrough
CT: control target
= control target key end

     0   :  { %9 = vsyncpa [#allocation3], 0  ;;  %s1012_s0 = inlined_call_operand.hbm [shape: f32[2,4,1,256], index: 0, kind: input, shape index: {}]   ;;  %s1013_s1 = inlined_call_operand.hbm [shape: s32[2,1,256], index: 1, kind: input, shape index: {}]   ;;  %s1014_s2 = inlined_call_operand.hbm [shape: f32[1,1,1,1], index: 2, kind: output, shape index: {0}]   ;;  %s1015_s3 = inlined_call_operand.hbm [shape: s32[1,1,1,1], index: 3, kind: output, shape index: {1}]  }
   0x1   :  { %10 = vsyncpa [#allocation6], 0 }
   0x2   :  { %11 = vsyncpa [#allocation4], 0 }
   0x3   :  { %12 = vsyncpa [#allocation9], 0  ;;  %s715_s12 = smov [#allocation2]  }
   0x4   :  { %s22_s13 = sshll.u32 %s715_s12, 4  ;;  %s23_s13 = int_to_ptr.vmem [resolvable:$true] %s22_s13 }
   0x5   :  { %s635_s14 = scalar_lea.vmem %s23_s13, 256  ;;  %p640_p1 = scmp.lt.s32.totalorder %s23_s13, %s23_s13 }
   0x6   :  { %p636_p0 = scmp.ne.s32.totalorder %s23_s13, %s635_s14  ;;  %p641_p2 = scmp.lt.s32.totalorder %s635_s14, %s635_s14 }
   0x8   :  { %p642_p3 = por %p641_p2, %p640_p1 }
   0xa   :  { %p643_p4 = pnand %p642_p3, %p636_p0 }
   0xc   :  { %646 = shalt.err (!%p643_p4)
}
   0xd   :  { %s716_s15 = smov 32   ;;  %s717_s16 = smov 2  }
   0xe   :  { %28 = dma.hbm_to_vmem [thread:$0]  %s1012_s0, 256, %s23_s13, [#allocation3], %s716_s15, %s716_s15, %s717_s16  }
   0xf   :  { %s718_s19 = smov [#allocation5]  }
  0x10   :  { %s38_s20 = sshll.u32 %s718_s19, 4  ;;  %s39_s20 = int_to_ptr.vmem [resolvable:$true] %s38_s20 }
  0x11   :  { %s655_s21 = scalar_lea.vmem %s39_s20, 64  ;;  %p660_p6 = scmp.lt.s32.totalorder %s39_s20, %s39_s20 }
  0x12   :  { %p656_p5 = scmp.ne.s32.totalorder %s39_s20, %s655_s21  ;;  %p661_p7 = scmp.lt.s32.totalorder %s655_s21, %s655_s21 }
  0x14   :  { %p662_p8 = por %p661_p7, %p660_p6 }
  0x16   :  { %p663_p9 = pnand %p662_p8, %p656_p5 }
  0x18   :  { %666 = shalt.err (!%p663_p9)
}
  0x19   :  { %44 = dma.hbm_to_vmem [thread:$0]  %s1013_s1, 64, %s39_s20, [#allocation6], %s716_s15, %s716_s15, %s717_s16  }
  0x1a   :  { %707 = dma.done.wait [#allocation3], 256  }
  0x1b   :  { %708 = vsyncadd [#allocation3], 4294967040 }
  0x1c   :  { %709 = dma.done.wait [#allocation6], 64  }
  0x1d   :  { %710 = vsyncadd [#allocation6], 4294967232  ;;  %vm58_vm0 = vcmask 0   ;;  %v71_v0 = vlaneseq  ;;  %v719_v1 = vmov 0.0   ;;  %v720_v2 = vmov 0   ;;  %s722_s1 = smov [#allocation7]  }
  0x1e   :  { %59 = vst.msk [vmem:[#allocation7] sm:$0x1] %vm58_vm0, %v719_v1  ;;  %60 = vst.msk [vmem:[#allocation8] sm:$0x1] %vm58_vm0, %v720_v2  ;;  %v61_v4 = vld [vmem:[#allocation2] sm:$0x3] }
  0x1f   :  { %vm754_vm1 = vcmp.lt.s32.totalorder %v71_v0, 256  ;;  %v62_v5 = vld [vmem:[#allocation2 + $0x2] sm:$0x3]  ;;  %v63_v6 = vld [vmem:[#allocation2 + $0x4] sm:$0x3]  ;;  %v800_v31 = vshrl.u32 %v71_v0, 7 }
  0x20   :  { %v758_v7 = vld [vmem:[#allocation2 + $0x6] sm:$0x3]  ;;  %v760_v8 = vld [vmem:[#allocation2 + $0x8] sm:$0x3]  ;;  %v762_v9 = vld [vmem:[#allocation2 + $0xa] sm:$0x3] }
  0x21   :  { %v764_v10 = vld [vmem:[#allocation2 + $0xc] sm:$0x3]  ;;  %v766_v11 = vld [vmem:[#allocation2 + $0xe] sm:$0x3]  ;;  %v75_v12 = vsel %vm754_vm1, %v61_v4, -inf  ;;  %v76_v13 = vsel %vm754_vm1, %v62_v5, -inf }
  0x22   :  { %v77_v14 = vsel %vm754_vm1, %v63_v6, -inf  ;;  %v79_v15 = vsel %vm754_vm1, %v758_v7, -inf  ;;  %v82_v18 = vsel %vm754_vm1, %v760_v8, -inf  ;;  %v83_v19 = vsel %vm754_vm1, %v762_v9, -inf  ;;  %v796_v29 = vld [vmem:[#allocation5] sm:$0x3] }
  0x23   :  { %v78_v16 = vmax.f32 %v75_v12, %v77_v14  ;;  %v80_v17 = vmax.f32 %v76_v13, %v79_v15  ;;  %v84_v20 = vsel %vm754_vm1, %v764_v10, -inf  ;;  %v86_v21 = vsel %vm754_vm1, %v766_v11, -inf  ;;  %v815_v42 = vld [vmem:[#allocation5 + $0x2] sm:$0x3]  ;;  %s559_s24 = sshll.u32 %s722_s1, 4  ;;  %s560_s24 = int_to_ptr.vmem [resolvable:$true] %s559_s24 }
  0x24   :  { %v85_v23 = vmax.f32 %v82_v18, %v84_v20  ;;  %v87_v24 = vmax.f32 %v83_v19, %v86_v21  ;;  %vm276_vm2 = vcmp.eq.s32.totalorder %v796_v29, 0  ;;  %vm277_vm3 = vcmp.eq.s32.totalorder %v796_v29, 1  ;;  %s667_s28 = scalar_lea.vmem %s560_s24, 16  ;;  %s671_s29 = scalar_lea.vmem %s560_s24, 32 }
  0x25   :  { %v789_v22 = vmax.f32 %v78_v16, %v80_v17  ;;  %v813_v41 = vsub.s32 0, %v800_v31  ;;  %vm201_vm4 = vcmask 1040384   ;;  %v818_v44 = vsub.s32 1, %v800_v31  ;;  %p668_p11 = scmp.ne.s32.totalorder %s560_s24, %s667_s28  ;;  %p672_p12 = scmp.lt.s32.totalorder %s560_s24, %s560_s24 }
  0x26   :  { %v791_v25 = vmax.f32 %v85_v23, %v87_v24  ;;  %vm414_vm5 = vcmp.lt.s32.totalorder %v800_v31, 1  ;;  %v284_v46 = vsel %vm276_vm2, %v61_v4, 0.0  ;;  %v285_v47 = vsel %vm277_vm3, %v62_v5, 0.0  ;;  %p673_p13 = scmp.lt.s32.totalorder %s671_s29, %s667_s28 }
  0x27   :  { %v89_v26 = vsub.f32 %v61_v4, %v789_v22  ;;  %v90_v27 = vsub.f32 %v62_v5, %v789_v22  ;;  %v91_v28 = vsub.f32 %v63_v6, %v789_v22  ;;  %v92_v30 = vsub.f32 %v758_v7, %v789_v22 }
  0x28   :  { %v93_v32 = vsub.f32 %v760_v8, %v791_v25  ;;  %v94_v33 = vsub.f32 %v762_v9, %v791_v25  ;;  %v95_v34 = vsub.f32 %v764_v10, %v791_v25  ;;  %v96_v38 = vsub.f32 %v766_v11, %v791_v25  ;;  %p674_p0 = por %p673_p13, %p672_p12 }
  0x29   :  { %v97_v35 = vmul.f32 1.442695, %v89_v26  ;;  %v99_v36 = vmul.f32 1.442695, %v90_v27  ;;  %v101_v37 = vmul.f32 1.442695, %v91_v28  ;;  %v303_v49 = vrot.slane %v284_v46, %v813_v41 }
  0x2a   :  { %v103_v39 = vmul.f32 1.442695, %v92_v30  ;;  %v105_v40 = vmul.f32 1.442695, %v93_v32  ;;  %v107_v43 = vmul.f32 1.442695, %v94_v33  ;;  %v311_v50 = vrot.slane %v285_v47, %v813_v41  ;;  %p675_p1 = pnand %p674_p0, %p668_p11 }
  0x2b   :  { %603 = vpow2.f32 %v97_v35  ;;  %v109_v45 = vmul.f32 1.442695, %v95_v34  ;;  %v111_v48 = vmul.f32 1.442695, %v96_v38  ;;  %vm278_vm6 = vcmp.eq.s32.totalorder %v796_v29, 2 }
  0x2c   :  { %605 = vpow2.f32 %v99_v36  ;;  %vm279_vm7 = vcmp.eq.s32.totalorder %v796_v29, 3  ;;  %vm280_vm8 = vcmp.eq.s32.totalorder %v815_v42, 0  ;;  %vm281_vm9 = vcmp.eq.s32.totalorder %v815_v42, 1 }
  0x2d   :  { %607 = vpow2.f32 %v101_v37  ;;  %vm282_vm10 = vcmp.eq.s32.totalorder %v815_v42, 2  ;;  %vm283_vm11 = vcmp.eq.s32.totalorder %v815_v42, 3  ;;  %v286_v51 = vsel %vm278_vm6, %v63_v6, 0.0 }
  0x2e   :  { %609 = vpow2.f32 %v103_v39  ;;  %v415_v52 = vsel %vm414_vm5, 1, %v720_v2  ;;  %v833_v53 = vsel %vm279_vm7, %v758_v7, 0.0  ;;  %v836_v54 = vsel %vm280_vm8, %v760_v8, 0.0 }
  0x2f   :  { %611 = vpow2.f32 %v105_v40  ;;  %v307_v55 = vrot.slane %v284_v46, %v818_v44  ;;  %v840_v56 = vsel %vm281_vm9, %v762_v9, 0.0  ;;  %v843_v57 = vsel %vm282_vm10, %v764_v10, 0.0 }
  0x30   :  { %613 = vpow2.f32 %v107_v43  ;;  %v846_v58 = vsel %vm283_vm11, %v766_v11, 0.0  ;;  %v315_v59 = vrot.slane %v285_v47, %v818_v44  ;;  %v319_v60 = vrot.slane %v286_v51, %v813_v41 }
  0x31   :  { %615 = vpow2.f32 %v109_v45  ;;  %v323_v61 = vrot.slane %v286_v51, %v818_v44  ;;  %v380_v62 = vsel %vm201_vm4, %v303_v49, 0.0  ;;  %v381_v63 = vsel %vm201_vm4, %v311_v50, 0.0 }
  0x32   :  { %617 = vpow2.f32 %v111_v48  ;;  %v721_v0 = vmov 1966171168   ;;  %v327_v3 = vrot.slane %v833_v53, %v813_v41  ;;  %v335_v4 = vrot.slane %v836_v54, %v813_v41 }
  0x33   :  { %v853_v2 = vunpack.c.l.s4 %v721_v0  ;;  %v419_v5 = vrot.slane %v415_v52, %v813_v41  ;;  %v331_v6 = vrot.slane %v833_v53, %v818_v44  ;;  %v339_v7 = vrot.slane %v836_v54, %v818_v44 }
  0x34   :  { %v343_v8 = vrot.slane %v840_v56, %v813_v41  ;;  %v347_v9 = vrot.slane %v840_v56, %v818_v44  ;;  %v351_v10 = vrot.slane %v843_v57, %v813_v41  ;;  %v355_v11 = vrot.slane %v843_v57, %v818_v44 }
  0x35   :  { %v359_v12 = vrot.slane %v846_v58, %v813_v41  ;;  %v382_v13 = vadd.f32 %v381_v63, %v380_v62  ;;  %v383_v15 = vsel %vm201_vm4, %v319_v60, 0.0  ;;  %v387_v16 = vsel %vm201_vm4, %v307_v55, 0.0 }
  0x36   :  { %v388_v17 = vsel %vm201_vm4, %v315_v59, 0.0  ;;  %v878_v18 = vsel %vm201_vm4, %v323_v61, 0.0  ;;  %v883_v23 = vsel %vm201_vm4, %v335_v4, 0.0  ;;  %vm410_vm12 = vcmp.ne.s32.totalorder %v796_v29, 4294967196 }
  0x37   :  { %vm411_vm13 = vcmp.ne.s32.totalorder %v815_v42, 4294967196  ;;  %vm889_vm14 = vcmp.ne.s32.totalorder %v419_v5, 0  ;;  %v395_v29 = vsel %vm201_vm4, %v343_v8, 0.0  ;;  %v401_v28 = vsel %vm201_vm4, %v339_v7, 0.0 }
  0x38   :  { %v604_v14 = vpop.eup %603  ;;  %vm924_vm15 = vmand %vm410_vm12, %vm889_vm14  ;;  %v402_v8 = vsel %vm201_vm4, %v347_v9, 0.0  ;;  %v385_v7 = vsel %vm201_vm4, %v327_v3, 0.0  ;;  %v392_v56 = vsel %vm201_vm4, %v331_v6, 0.0  ;;  %v397_v3 = vsel %vm201_vm4, %v351_v10, 0.0 }
  0x39   :  { %v606_v19 = vpop.eup %605  ;;  %v124_v20 = vrot.slane %v604_v14, %v813_v41  ;;  %v128_v21 = vrot.slane %v604_v14, %v818_v44  ;;  %vm932_vm1 = vmand %vm411_vm13, %vm889_vm14  ;;  %v404_v53 = vsel %vm201_vm4, %v355_v11, 0.0  ;;  %v399_v10 = vsel %vm201_vm4, %v359_v12, 0.0 }
  0x3a   :  { %v608_v24 = vpop.eup %607  ;;  %v132_v26 = vrot.slane %v606_v19, %v813_v41  ;;  %v136_v27 = vrot.slane %v606_v19, %v818_v44 }
  0x3b   :  { %v610_v30 = vpop.eup %609  ;;  %v140_v32 = vrot.slane %v608_v24, %v813_v41  ;;  %v144_v33 = vrot.slane %v608_v24, %v818_v44  ;;  %v202_v34 = vsel %vm201_vm4, %v124_v20, 0.0  ;;  %v209_v35 = vsel %vm201_vm4, %v128_v21, 0.0 }
  0x3c   :  { %v612_v36 = vpop.eup %611  ;;  %v148_v37 = vrot.slane %v610_v30, %v813_v41  ;;  %v152_v38 = vrot.slane %v610_v30, %v818_v44  ;;  %v203_v39 = vsel %vm201_vm4, %v132_v26, 0.0  ;;  %v210_v40 = vsel %vm201_vm4, %v136_v27, 0.0 }
  0x3d   :  { %v614_v43 = vpop.eup %613  ;;  %v156_v45 = vrot.slane %v612_v36, %v813_v41  ;;  %v160_v46 = vrot.slane %v612_v36, %v818_v44  ;;  %v204_v47 = vadd.f32 %v203_v39, %v202_v34  ;;  %v205_v48 = vsel %vm201_vm4, %v140_v32, 0.0 }
  0x3e   :  { %v616_v49 = vpop.eup %615  ;;  %v164_v50 = vrot.slane %v614_v43, %v813_v41  ;;  %v168_v51 = vrot.slane %v614_v43, %v818_v44  ;;  %v207_v52 = vsel %vm201_vm4, %v148_v37, 0.0  ;;  %v211_v55 = vadd.f32 %v210_v40, %v209_v35 }
  0x3f   :  { %v618_v59 = vpop.eup %617  ;;  %v172_v60 = vrot.slane %v616_v49, %v813_v41  ;;  %v176_v61 = vrot.slane %v616_v49, %v818_v44  ;;  %v206_v62 = vadd.f32 %v205_v48, %v204_v47  ;;  %v212_v63 = vsel %vm201_vm4, %v144_v33, 0.0 }
  0x40   :  { %v180_v0 = vrot.slane %v618_v59, %v813_v41  ;;  %v184_v4 = vrot.slane %v618_v59, %v818_v44  ;;  %v213_v5 = vadd.f32 %v212_v63, %v211_v55  ;;  %v214_v14 = vsel %vm201_vm4, %v152_v38, 0.0 }
  0x41   :  { %v208_v19 = vadd.f32 %v207_v52, %v206_v62  ;;  %v216_v20 = vsel %vm201_vm4, %v156_v45, 0.0  ;;  %v217_v21 = vsel %vm201_vm4, %v164_v50, 0.0  ;;  %v219_v24 = vsel %vm201_vm4, %v172_v60, 0.0 }
  0x42   :  { %v215_v26 = vadd.f32 %v214_v14, %v213_v5  ;;  %v218_v27 = vadd.f32 %v217_v21, %v216_v20  ;;  %v223_v30 = vsel %vm201_vm4, %v160_v46, 0.0  ;;  %v384_v32 = vadd.f32 %v383_v15, %v382_v13 }
  0x43   :  { %v221_v33 = vsel %vm201_vm4, %v180_v0, 0.0  ;;  %v224_v34 = vsel %vm201_vm4, %v168_v51, 0.0  ;;  %v226_v35 = vsel %vm201_vm4, %v176_v61, 0.0  ;;  %619 = vlog2.f32 %v208_v19 }
  0x44   :  { %v220_v37 = vadd.f32 %v219_v24, %v218_v27  ;;  %v225_v38 = vadd.f32 %v224_v34, %v223_v30  ;;  %621 = vlog2.f32 %v215_v26  ;;  %v389_v39 = vadd.f32 %v388_v17, %v387_v16 }
  0x45   :  { %v228_v15 = vsel %vm201_vm4, %v184_v4, 0.0  ;;  %v583_v40 = vsel %vm924_vm15, 1.0, %v719_v1  ;;  %v584_v16 = vsel %vm932_vm1, 1.0, %v719_v1  ;;  %v396_v50 = vadd.f32 %v395_v29, %v883_v23 }
  0x46   :  { %v222_v42 = vadd.f32 %v221_v33, %v220_v37  ;;  %v227_v17 = vadd.f32 %v226_v35, %v225_v38  ;;  %v516_v43 = vrot.slane %v583_v40, %v813_v41  ;;  %v520_v45 = vrot.slane %v583_v40, %v818_v44 }
  0x47   :  { %v524_v46 = vrot.slane %v584_v16, %v813_v41  ;;  %v528_v1 = vrot.slane %v584_v16, %v818_v44  ;;  %v391_v48 = vadd.f32 %v878_v18, %v389_v39  ;;  %v403_v18 = vadd.f32 %v402_v8, %v401_v28 }
  0x48   :  { %v229_v47 = vadd.f32 %v228_v15, %v227_v17  ;;  %623 = vlog2.f32 %v222_v42  ;;  %v533_v54 = vsel %vm201_vm4, %v516_v43, 0.0  ;;  %v534_v9 = vsel %vm201_vm4, %v520_v45, 0.0 }
  0x49   :  { %v536_v49 = vsel %vm201_vm4, %v524_v46, 0.0  ;;  %v535_v51 = vadd.f32 %v534_v9, %v533_v54  ;;  %v363_v52 = vrot.slane %v846_v58, %v818_v44  ;;  %v538_v6 = vsel %vm201_vm4, %v528_v1, 0.0 }
  0x4a   :  { %625 = vlog2.f32 %v229_v47  ;;  %v386_v55 = vadd.f32 %v385_v7, %v384_v32  ;;  %v393_v59 = vadd.f32 %v392_v56, %v391_v48  ;;  %v245_v60 = vunpack.c.0.s8 %v853_v2 }
  0x4b   :  { %v537_v23 = vadd.f32 %v536_v49, %v535_v51  ;;  %v398_v61 = vadd.f32 %v397_v3, %v396_v50  ;;  %v405_v62 = vadd.f32 %v404_v53, %v403_v18  ;;  %v406_v0 = vsel %vm201_vm4, %v363_v52, 0.0 }
  0x4c   :  { %v427_v4 = vcombine.low %v386_v55, %v393_v59  ;;  %v248_v19 = vsub.s32 %v245_v60, %v800_v31 }
  0x4d   :  { %v539_v63 = vadd.f32 %v538_v6, %v537_v23  ;;  %v400_v20 = vadd.f32 %v399_v10, %v398_v61  ;;  %v407_v21 = vadd.f32 %v406_v0, %v405_v62  ;;  %v463_v6 = vld [vmem:[#allocation7] sm:$0x1] }
  0x4e   :  { %v434_v24 = vrot.slane %v427_v4, %v248_v19 }
  0x4f   :  { %v442_v32 = vcombine.low %v400_v20, %v407_v21 }
  0x50   :  { %v620_v57 = vpop.eup %619  ;;  %v441_v34 = vrot.slane %v434_v24, %v248_v19 }
  0x51   :  { %v622_v11 = vpop.eup %621  ;;  %v231_v5 = vmul.f32 0.6931472, %v620_v57  ;;  %v449_v38 = vrot.slane %v442_v32, %v248_v19 }
  0x52   :  { %v233_v14 = vmul.f32 0.6931472, %v622_v11 }
  0x53   :  { %v456_v31 = vrot.slane %v449_v38, %v248_v19 }
  0x54   :  { %v242_v2 = vcombine.low %v231_v5, %v233_v14 }
  0x55   :  { %v624_v26 = vpop.eup %623 }
  0x56   :  { %v235_v27 = vmul.f32 0.6931472, %v624_v26  ;;  %v249_v30 = vrot.slane %v242_v2, %v248_v19 }
  0x57   :  { %v626_v58 = vpop.eup %625 }
  0x58   :  { %v237_v33 = vmul.f32 0.6931472, %v626_v58  ;;  %v256_v12 = vrot.slane %v249_v30, %v248_v19 }
  0x5a   :  { %v257_v35 = vcombine.low %v235_v27, %v237_v33  ;;  %v274_v37 = vadd.f32 %v256_v12, %v789_v22 }
  0x5c   :  { %v264_v39 = vrot.slane %v257_v35, %v248_v19  ;;  %v459_v15 = vsub.f32 %v274_v37, %v441_v34 }
  0x5e   :  { %v271_v29 = vrot.slane %v264_v39, %v248_v19  ;;  %v461_v40 = vsel %vm924_vm15, %v459_v15, 0.0 }
  0x5f   :  { %v469_v16 = vrot.slane %v461_v40, %v813_v41  ;;  %v473_v42 = vrot.slane %v461_v40, %v818_v44 }
  0x60   :  { %v275_v17 = vadd.f32 %v271_v29, %v791_v25 }
  0x61   :  { %v486_v28 = vsel %vm201_vm4, %v469_v16, 0.0  ;;  %v487_v43 = vsel %vm201_vm4, %v473_v42, 0.0 }
  0x62   :  { %v460_v8 = vsub.f32 %v275_v17, %v456_v31  ;;  %v488_v45 = vadd.f32 %v487_v43, %v486_v28 }
  0x64   :  { %v462_v22 = vsel %vm932_vm1, %v460_v8, 0.0 }
  0x65   :  { %v477_v46 = vrot.slane %v462_v22, %v813_v41  ;;  %v481_v36 = vrot.slane %v462_v22, %v818_v44 }
  0x67   :  { %v489_v1 = vsel %vm201_vm4, %v477_v46, 0.0  ;;  %v491_v47 = vsel %vm201_vm4, %v481_v36, 0.0 }
  0x68   :  { %v490_v48 = vadd.f32 %v489_v1, %v488_v45 }
  0x6a   :  { %v492_v54 = vadd.f32 %v491_v47, %v490_v48 }
  0x6c   :  { %493 = vadd.xlane.f32.xlu0 %v492_v54 }
  0x70   :  { %540 = vadd.xlane.f32.xlu0 %v539_v63 }
  0xf5   :  { %v494_v25 = vpop.xlane.xlu0 %493 }
  0xf6   :  { %v495_v7 = vrot.slane %v494_v25, 4 }
  0xf8   :  { %v496_v56 = vadd.f32 %v495_v7, %v494_v25 }
  0xf9   :  { %v541_v9 = vpop.xlane.xlu0 %540 }
  0xfa   :  { %v497_v49 = vrot.slane %v496_v56, 2  ;;  %v542_v13 = vrot.slane %v541_v9, 4 }
  0xfc   :  { %v543_v50 = vadd.f32 %v542_v13, %v541_v9  ;;  %v498_v18 = vadd.f32 %v497_v49, %v496_v56 }
  0xfe   :  { %v544_v51 = vrot.slane %v543_v50, 2  ;;  %v499_v41 = vrot.slane %v498_v18, 1 }
 0x100   :  { %v545_v52 = vadd.f32 %v544_v51, %v543_v50  ;;  %v500_v44 = vadd.f32 %v499_v41, %v498_v18 }
 0x102   :  { %585 = vpush %v500_v44  ;;  %v546_v3 = vrot.slane %v545_v52, 1 }
 0x104   :  { %v547_v53 = vadd.f32 %v546_v3, %v545_v52 }
 0x106   :  { %587 = vpush %v547_v53 }
 0x133   :  { %s586_s0 = spop %585 }
 0x134   :  { %v502_v55 = vstv %s586_s0 }
 0x135   :  { %v503_v59 = vadd.f32 %v502_v55, %v463_v6 }
 0x137   :  { %505 = vst.msk [vmem:[#allocation7] sm:$0x1] %vm58_vm0, %v503_v59  ;;  %s588_s25 = spop %587 }
 0x138   :  { %p589_p10 = scmp.lt.s32.totalorder %s588_s25, 0  ;;  %s590_s26 = sceil.f32 %s588_s25 }
 0x139   :  { %s591_s27 = sfloor.f32 %s588_s25 }
 0x13a   :  { %s1025_s26 = smov (!%p589_p10, %s590_s26), %s591_s27 }
 0x13b   :  { %678 = shalt.err (!%p675_p1)
}
 0x13c   :  { %562 = dma.vmem_to_hbm [thread:$0]  %s560_s24, 16, %s1014_s2, [#allocation4]   ;;  %v506_v23 = vld [vmem:[#allocation8] sm:$0x1] }
 0x13d   :  { %s593_s5 = scvt.f32.s32 %s1025_s26  ;;  %s723_s6 = smov [#allocation8]  }
 0x13e   :  { %s569_s7 = sshll.u32 %s723_s6, 4  ;;  %s570_s7 = int_to_ptr.vmem [resolvable:$true] %s569_s7 }
 0x13f   :  { %v550_v60 = vstv %s593_s5  ;;  %s687_s8 = scalar_lea.vmem %s570_s7, 16  ;;  %s691_s9 = scalar_lea.vmem %s570_s7, 32 }
 0x140   :  { %v551_v61 = vadd.s32 %v550_v60, %v506_v23  ;;  %p688_p2 = scmp.ne.s32.totalorder %s570_s7, %s687_s8  ;;  %p692_p3 = scmp.lt.s32.totalorder %s570_s7, %s570_s7 }
 0x141   :  { %p693_p4 = scmp.lt.s32.totalorder %s691_s9, %s687_s8 }
 0x142   :  { %552 = vst.msk [vmem:[#allocation8] sm:$0x1] %vm58_vm0, %v551_v61 }
 0x143   :  { %p694_p5 = por %p693_p4, %p692_p3 }
 0x145   :  { %p695_p6 = pnand %p694_p5, %p688_p2 }
 0x147   :  { %698 = shalt.err (!%p695_p6)
}
 0x148   :  { %572 = dma.vmem_to_hbm [thread:$0]  %s570_s7, 16, %s1015_s3, [#allocation9]  }
 0x149   :  { %711 = dma.done.wait [#allocation4], 16  }
 0x14a   :  { %712 = vsyncadd [#allocation4], 4294967280 }
 0x14b   :  { %713 = dma.done.wait [#allocation9], 16  }
 0x14c   :  { %714 = vsyncadd [#allocation9], 4294967280 }
 0x14d   :  { %579 = vsyncpa [#allocation3], 1 }
 0x14e   :  { %580 = vsyncpa [#allocation6], 1 }
 0x14f   :  { %581 = vsyncpa [#allocation4], 1 }
 0x150   :  { %582 = vsyncpa [#allocation9], 1 }

</bundles_post_ra>
